<compile_context>
chip_gen: v6e
topology: v6e:2x2x1
jax: 0.10.0
libtpu: 0.0.40
codegen_flags: <defaults>
</compile_context>

<pallas_src>
import jax
import jax.numpy as jnp
from jax.experimental import pallas as pl
from jax.experimental.pallas import tpu as pltpu


# ------------------------------ fused kernel -------------------------------

def _featurier_kernel(xx_ref, w1e_ref, b1m_ref, w2_ref, b2_ref, o_ref):
    # Per grid step (NB batch samples):
    #   xx_ref : (NB, S2, K1)   7x7/stride-4 input patches per stage-2 pixel
    #   w1e_ref: (K1, 144)      expanded conv1 weight (stage-2-lhs column order)
    #   b1m_ref: (S2, 144)      conv1 bias, -1e9 on conv2's zero-pad tap columns
    #   w2_ref : (144, C2)      conv2 weight, rows ordered (dy2, dx2, c1), bf16
    #   b2_ref : (1, C2)
    #   o_ref  : (NB, C2)       pooled features (dense sublane/lane store)
    nb, s2, k1 = xx_ref.shape
    k2 = b1m_ref.shape[1]
    c2 = o_ref.shape[1]

    # ---- stage 1: conv3x3/s2 (1 -> C1) + ReLU, one MXU matmul ----------------
    # Output columns are already laid out as the stage-2 lhs (tap-major, c1
    # minor); conv2's zero padding falls out of the -1e9 bias entries.
    xx = xx_ref[...].reshape(nb * s2, k1)                       # f32, M = NB*S2
    h = jnp.dot(xx, w1e_ref[...], preferred_element_type=jnp.float32)
    h = jnp.maximum(h.reshape(nb, s2, k2) + b1m_ref[...], 0.0)  # bias + mask

    # ---- stage 2: conv3x3/s2 (C1 -> C2) + ReLU, one K=144 MXU matmul ---------
    y = jnp.dot(h.reshape(nb * s2, k2).astype(w2_ref.dtype), w2_ref[...],
                preferred_element_type=jnp.float32)             # (NB*S2, C2)
    y = jnp.maximum(y + b2_ref[...], 0.0)

    # ---- global average pool over the S2 stage-2 positions -------------------
    o_ref[...] = jnp.sum(y.reshape(nb, s2, c2), axis=1) * (1.0 / s2)


# --------------------------- parameter preparation --------------------------

_K1_PAD = 64  # 49 -> 64 for clean sublane tiling


def _prepare_params(params, px_size):
    """Fold the two conv weights/biases into the kernel's matmul operands."""
    H, W = px_size
    U2, V2 = H // 4, W // 4
    c1 = params["w1"].shape[-1]
    c2 = params["w2"].shape[-1]

    w1 = params["w1"].reshape(3, 3, c1).astype(jnp.float32)       # in_chans = 1
    w2 = params["w2"].reshape(3, 3, c1, c2).astype(jnp.float32)

    # Expanded stage-1 weight (49, 9*c1): column block t2=(dy2,dx2) maps the
    # 7x7/stride-4 patch to conv1's output at stage-1 pixel (2u+dy2-1, 2v+dx2-1);
    # its 3x3 conv1 taps live at patch rows ky=2*dy2+dy1, cols kx=2*dx2+dx1.
    w1e = jnp.zeros((7, 7, 3, 3, c1), jnp.float32)
    for dy2 in range(3):
        for dx2 in range(3):
            w1e = w1e.at[2 * dy2:2 * dy2 + 3,
                         2 * dx2:2 * dx2 + 3, dy2, dx2, :].set(w1)
    w1e = w1e.reshape(49, 9 * c1)
    w1e = jnp.pad(w1e, ((0, _K1_PAD - 49), (0, 0)))               # K1 pad -> 64

    # Per-(u,v)-row stage-1 bias with -1e9 on conv2's zero-pad tap columns
    # (ReLU then yields exact zeros there, matching conv2's zero padding).
    uu = jnp.arange(U2)[:, None, None, None]
    vv = jnp.arange(V2)[None, :, None, None]
    d2y = jnp.arange(3)[None, None, :, None]
    d2x = jnp.arange(3)[None, None, None, :]
    valid = ((uu > 0) | (d2y > 0)) & ((vv > 0) | (d2x > 0))       # (U2,V2,3,3)
    b1 = params["b1"].reshape(c1).astype(jnp.float32)
    b1m = jnp.where(valid[..., None], b1, -1e9).reshape(U2 * V2, 9 * c1)

    w2r = w2.reshape(9 * c1, c2).astype(jnp.bfloat16)             # bf16 on MXU
    b2 = params["b2"].reshape(1, c2).astype(jnp.float32)
    return w1e, b1m, w2r, b2


def _extract_patches(x, px_size):
    """(B,H,W) -> (B, S2, 49): the 7x7/stride-4 receptive-field patch of every
    stage-2 output pixel (top/left zero pad 3 = composed padding of both convs)."""
    B = x.shape[0]
    H, W = px_size
    U2, V2 = H // 4, W // 4
    xp = jnp.pad(x, ((0, 0), (3, 0), (3, 0)))                    # (B, H+3, W+3)
    taps = []
    for ky in range(7):
        for kx in range(7):
            taps.append(xp[:, ky:ky + 4 * (U2 - 1) + 1:4,
                           kx:kx + 4 * (V2 - 1) + 1:4])           # (B, U2, V2)
    xx = jnp.stack(taps, axis=-1)                                 # (B,U2,V2,49)
    return xx.reshape(B, U2 * V2, 49)


# ------------------------------- JAX wrapper --------------------------------

def featurier_forward(x, params, px_size, block_b=16):
    """Mirror of Featurier.forward: expand -> backbone -> (B, num_features)."""
    B = x.shape[0]
    H, W = px_size
    assert H % 4 == 0 and W % 4 == 0, "this path assumes px_size % 4 == 0"
    U2, V2 = H // 4, W // 4
    S2 = U2 * V2
    c1 = params["w1"].shape[-1]
    c2 = params["w2"].shape[-1]

    w1e, b1m, w2r, b2 = _prepare_params(params, px_size)

    # torch: x = x.expand(B, 1, H, W); in_chans == 1 so drop the channel dim.
    x = jnp.broadcast_to(x, (B, 1, H, W)).reshape(B, H, W).astype(jnp.float32)

    xx = _extract_patches(x, px_size)                             # (B, S2, 49)
    xx = jnp.pad(xx, ((0, 0), (0, 0), (0, _K1_PAD - 49)))         # K1 -> 64, f32

    # Batch blocking: NB samples per grid step (M = NB*S2 on the MXU; dense
    # (NB, C2) output stores). block_b=16 keeps >=2 grid steps once B > 16 so
    # dimension_semantics=("parallel",) shards across both v7x TensorCores.
    NB = min(block_b, B)
    n_steps = pl.cdiv(B, NB)
    Bp = NB * n_steps
    if Bp != B:
        xx = jnp.pad(xx, ((0, Bp - B), (0, 0), (0, 0)))

    flops = 2 * Bp * S2 * (49 * 9 * c1 + 9 * c1 * c2)
    bytes_accessed = (xx.size * 4 + w1e.size * 4 + b1m.size * 4
                      + w2r.size * 2 + b2.size * 4 + Bp * c2 * 4)

    out = pl.pallas_call(
        _featurier_kernel,
        out_shape=jax.ShapeDtypeStruct((Bp, c2), jnp.float32),
        grid=(n_steps,),
        in_specs=[
            pl.BlockSpec((NB, S2, _K1_PAD), lambda b: (b, 0, 0)),
            pl.BlockSpec((_K1_PAD, 9 * c1), lambda b: (0, 0)),
            pl.BlockSpec((S2, 9 * c1), lambda b: (0, 0)),
            pl.BlockSpec((9 * c1, c2), lambda b: (0, 0)),
            pl.BlockSpec((1, c2), lambda b: (0, 0)),
        ],
        out_specs=pl.BlockSpec((NB, c2), lambda b: (b, 0)),
        compiler_params=pltpu.CompilerParams(
            dimension_semantics=("parallel",)),
        cost_estimate=pl.CostEstimate(
            flops=flops, transcendentals=0, bytes_accessed=bytes_accessed),
    )(xx, w1e, b1m, w2r, b2)

    # torch: x = x.view(x.size(0), -1)
    return out[:B]


def init_params(c1=16, c2=32):
    """Deterministic synthetic backbone parameters (in_chans=1)."""
    k = jax.random.PRNGKey(42)
    k1, k2, k3, k4 = jax.random.split(k, 4)
    return {
        "w1": jax.random.normal(k1, (3, 3, 1, c1), jnp.float32) * 0.2,
        "b1": jax.random.normal(k2, (c1,), jnp.float32) * 0.01,
        "w2": jax.random.normal(k3, (3, 3, c1, c2), jnp.float32) * 0.05,
        "b2": jax.random.normal(k4, (c2,), jnp.float32) * 0.01,
    }


def reference_forward(x, params, px_size):
    """Pure-JAX reference (lax.conv) for correctness checking."""
    B = x.shape[0]
    H, W = px_size
    xi = jnp.broadcast_to(x, (B, 1, H, W)).transpose(0, 2, 3, 1).astype(jnp.float32)
    h = jax.lax.conv_general_dilated(
        xi, params["w1"], (2, 2), ((1, 1), (1, 1)),
        dimension_numbers=("NHWC", "HWIO", "NHWC"),
        precision=jax.lax.Precision.HIGHEST)
    h = jnp.maximum(h + params["b1"][None, None, None, :], 0.0)
    h = jax.lax.conv_general_dilated(
        h, params["w2"], (2, 2), ((1, 1), (1, 1)),
        dimension_numbers=("NHWC", "HWIO", "NHWC"),
        precision=jax.lax.Precision.HIGHEST)
    h = jnp.maximum(h + params["b2"][None, None, None, :], 0.0)
    return jnp.mean(h, axis=(1, 2))


if __name__ == "__main__":
    px_size = (16, 16)
    params = init_params()

    # Deterministic example input, NCHW like the PyTorch module expects.
    x = jax.random.normal(jax.random.PRNGKey(0), (2, 1, 16, 16), jnp.float32)

    out = jax.block_until_ready(featurier_forward(x, params, px_size))
    ref = jax.block_until_ready(reference_forward(x, params, px_size))

    assert out.shape == (2, 32), out.shape
    assert out.dtype == jnp.float32
    assert jnp.allclose(out, ref, atol=1e-2, rtol=1e-2), (
        float(jnp.max(jnp.abs(out - ref))))
    print("KERNEL_OK")
</pallas_src>

<mosaic_0001>
module attributes {stable_mosaic.version = 11 : i64} {
  func.func @_featurier_kernel(%arg0: i32, %arg1: memref<2x16x64xf32, #tpu.memory_space<vmem>>, %arg2: memref<64x144xf32, #tpu.memory_space<vmem>>, %arg3: memref<16x144xf32, #tpu.memory_space<vmem>>, %arg4: memref<144x32xbf16, #tpu.memory_space<vmem>>, %arg5: memref<1x32xf32, #tpu.memory_space<vmem>>, %arg6: memref<2x32xf32, #tpu.memory_space<vmem>>) attributes {dimension_semantics = [#tpu.dimension_semantics<parallel>], iteration_bounds = array<i64: 1>, scalar_prefetch = 0 : i64, scratch_operands = 0 : i64, tpu.core_type = #tpu.core_type<tc>, window_params = [{transform_indices = @transform_0, window_bounds = array<i64: 2, 16, 64>}, {pipeline_mode = #tpu.pipeline_mode<synchronous>, transform_indices = @transform_1, window_bounds = array<i64: 64, 144>}, {pipeline_mode = #tpu.pipeline_mode<synchronous>, transform_indices = @transform_2, window_bounds = array<i64: 16, 144>}, {pipeline_mode = #tpu.pipeline_mode<synchronous>, transform_indices = @transform_3, window_bounds = array<i64: 144, 32>}, {pipeline_mode = #tpu.pipeline_mode<synchronous>, transform_indices = @transform_4, window_bounds = array<i64: 1, 32>}, {transform_indices = @transform_5, window_bounds = array<i64: 2, 32>}]} {
    %c0 = arith.constant 0 : index
    %c0_0 = arith.constant 0 : index
    %c0_1 = arith.constant 0 : index
    %0 = vector.load %arg1[%c0, %c0_0, %c0_1] : memref<2x16x64xf32, #tpu.memory_space<vmem>>, vector<2x16x64xf32>
    %1 = vector.shape_cast %0 : vector<2x16x64xf32> to vector<32x64xf32>
    %c0_2 = arith.constant 0 : index
    %c0_3 = arith.constant 0 : index
    %2 = vector.load %arg2[%c0_2, %c0_3] : memref<64x144xf32, #tpu.memory_space<vmem>>, vector<64x144xf32>
    %cst = arith.constant dense<0.000000e+00> : vector<32x144xf32>
    %3 = tpu.matmul %1, %2, %cst {dimension_numbers = #tpu.dot_dimension_numbers<[1], [0], [0], [1], [0, 0, 1, 1], [], []>} : vector<32x64xf32>, vector<64x144xf32>, vector<32x144xf32> -> vector<32x144xf32>
    %4 = vector.shape_cast %3 : vector<32x144xf32> to vector<2x16x144xf32>
    %c0_4 = arith.constant 0 : index
    %c0_5 = arith.constant 0 : index
    %5 = vector.load %arg3[%c0_4, %c0_5] : memref<16x144xf32, #tpu.memory_space<vmem>>, vector<16x144xf32>
    %6 = vector.shape_cast %5 : vector<16x144xf32> to vector<1x16x144xf32>
    %7 = vector.broadcast %6 : vector<1x16x144xf32> to vector<2x16x144xf32>
    %8 = arith.addf %4, %7 : vector<2x16x144xf32>
    %cst_6 = arith.constant 0.000000e+00 : f32
    %9 = vector.broadcast %cst_6 : f32 to vector<2x16x144xf32>
    %10 = arith.maximumf %8, %9 : vector<2x16x144xf32>
    %11 = vector.shape_cast %10 : vector<2x16x144xf32> to vector<32x144xf32>
    %12 = arith.truncf %11 : vector<32x144xf32> to vector<32x144xbf16>
    %c0_7 = arith.constant 0 : index
    %c0_8 = arith.constant 0 : index
    %13 = vector.load %arg4[%c0_7, %c0_8] : memref<144x32xbf16, #tpu.memory_space<vmem>>, vector<144x32xbf16>
    %cst_9 = arith.constant dense<0.000000e+00> : vector<32x32xf32>
    %14 = tpu.matmul %12, %13, %cst_9 {dimension_numbers = #tpu.dot_dimension_numbers<[1], [0], [0], [1], [0, 0, 1, 1], [], []>} : vector<32x144xbf16>, vector<144x32xbf16>, vector<32x32xf32> -> vector<32x32xf32>
    %c0_10 = arith.constant 0 : index
    %c0_11 = arith.constant 0 : index
    %15 = vector.load %arg5[%c0_10, %c0_11] : memref<1x32xf32, #tpu.memory_space<vmem>>, vector<1x32xf32>
    %16 = vector.broadcast %15 : vector<1x32xf32> to vector<32x32xf32>
    %17 = arith.addf %14, %16 : vector<32x32xf32>
    %cst_12 = arith.constant 0.000000e+00 : f32
    %18 = vector.broadcast %cst_12 : f32 to vector<32x32xf32>
    %19 = arith.maximumf %17, %18 : vector<32x32xf32>
    %20 = vector.shape_cast %19 : vector<32x32xf32> to vector<2x16x32xf32>
    %cst_13 = arith.constant dense<0.000000e+00> : vector<2x32xf32>
    %21 = vector.multi_reduction <add>, %20, %cst_13 [1] : vector<2x16x32xf32> to vector<2x32xf32>
    %cst_14 = arith.constant 6.250000e-02 : f32
    %22 = vector.broadcast %cst_14 : f32 to vector<2x32xf32>
    %23 = arith.mulf %21, %22 : vector<2x32xf32>
    %c0_15 = arith.constant 0 : index
    %c0_16 = arith.constant 0 : index
    %24 = vector.load %arg6[%c0_15, %c0_16] : memref<2x32xf32, #tpu.memory_space<vmem>>, vector<2x32xf32>
    tpu.vector_store %arg6[%c0_15, %c0_16], %23 {strides = array<i32>} : memref<2x32xf32, #tpu.memory_space<vmem>>, vector<2x32xf32>,
    return
  }
  func.func @transform_0(%arg0: i32) -> (i32, i32, i32) {
    %c0_i32 = arith.constant 0 : i32
    %c0_i32_0 = arith.constant 0 : i32
    %c0_i32_1 = arith.constant 0 : i32
    return %arg0, %c0_i32, %c0_i32_0 : i32, i32, i32
  }
  func.func @transform_1(%arg0: i32) -> (i32, i32) {
    %c0_i32 = arith.constant 0 : i32
    %c0_i32_0 = arith.constant 0 : i32
    %c0_i32_1 = arith.constant 0 : i32
    return %c0_i32, %c0_i32_0 : i32, i32
  }
  func.func @transform_2(%arg0: i32) -> (i32, i32) {
    %c0_i32 = arith.constant 0 : i32
    %c0_i32_0 = arith.constant 0 : i32
    %c0_i32_1 = arith.constant 0 : i32
    return %c0_i32, %c0_i32_0 : i32, i32
  }
  func.func @transform_3(%arg0: i32) -> (i32, i32) {
    %c0_i32 = arith.constant 0 : i32
    %c0_i32_0 = arith.constant 0 : i32
    %c0_i32_1 = arith.constant 0 : i32
    return %c0_i32, %c0_i32_0 : i32, i32
  }
  func.func @transform_4(%arg0: i32) -> (i32, i32) {
    %c0_i32 = arith.constant 0 : i32
    %c0_i32_0 = arith.constant 0 : i32
    %c0_i32_1 = arith.constant 0 : i32
    return %c0_i32, %c0_i32_0 : i32, i32
  }
  func.func @transform_5(%arg0: i32) -> (i32, i32) {
    %c0_i32 = arith.constant 0 : i32
    %c0_i32_0 = arith.constant 0 : i32
    return %arg0, %c0_i32 : i32, i32
  }
}

</mosaic_0001>

<bundles_post_ra>
// kernel: tpu_custom_call.1
= control target key start
LH: loop header
LB: loop body
LE: loop exit
PB: predicated region body
PF: predicated region fallthrough
CT: control target
= control target key end

     0   :  { %10 = vsyncpa [#allocation3], 0  ;;  %s554_s0 = inlined_call_operand.vmem [shape: f32[2,16,64], index: 0, kind: input, shape index: {}]   ;;  %s555_s1 = inlined_call_operand.hbm [shape: f32[64,144], index: 1, kind: input, shape index: {}]   ;;  %s556_s2 = inlined_call_operand.vmem [shape: f32[16,144], index: 2, kind: input, shape index: {}]   ;;  %s557_s3 = inlined_call_operand.vmem [shape: bf16[144,32], index: 3, kind: input, shape index: {}]   ;;  %s558_s4 = inlined_call_operand.vmem [shape: f32[1,32], index: 4, kind: input, shape index: {}]   ;;  %s559_s5 = inlined_call_operand.hbm [shape: f32[2,32], index: 5, kind: output, shape index: {}]  }
   0x1   :  { %11 = vsyncpa [#allocation4], 0  ;;  %s439_s18 = smov [#allocation2]  }
   0x2   :  { %s19_s19 = sshll.u32 %s439_s18, 4  ;;  %s20_s19 = int_to_ptr.vmem [resolvable:$true] %s19_s19 }
   0x3   :  { %s403_s20 = scalar_lea.vmem %s20_s19, 2048  ;;  %p408_p1 = scmp.lt.s32.totalorder %s20_s19, %s20_s19 }
   0x4   :  { %p404_p0 = scmp.ne.s32.totalorder %s20_s19, %s403_s20  ;;  %p409_p2 = scmp.lt.s32.totalorder %s403_s20, %s403_s20 }
   0x6   :  { %p410_p3 = por %p409_p2, %p408_p1 }
   0x8   :  { %p411_p4 = pnand %p410_p3, %p404_p0 }
   0xa   :  { %414 = shalt.err (!%p411_p4)
}
   0xb   :  { %s440_s21 = smov 256   ;;  %s441_s22 = smov 16  }
   0xc   :  { %25 = dma.hbm_to_vmem [thread:$0]  %s555_s1, 2048, %s20_s19, [#allocation3], %s440_s21, %s440_s21, %s441_s22  }
   0xd   :  { %435 = dma.done.wait [#allocation3], 2048  }
   0xe   :  { %436 = vsyncadd [#allocation3], 4294965248  ;;  %v442_v0 = vmov 0.0   ;;  %v443_v1 = vmov 0   ;;  %v55_v2 = vld [vmem:[#allocation2 + $0x78] sm:$0xff]  ;;  %v54_v3 = vld [vmem:[#allocation2 + $0x70] sm:$0xff] }
   0xf   :  { %133 = vmatprep.mubr.f32.mxu0 %v442_v0  ;;  %268 = vmatprep.subr.bf16.mxu1 %v443_v1  ;;  %v53_v4 = vld [vmem:[#allocation2 + $0x68] sm:$0xff]  ;;  %v52_v5 = vld [vmem:[#allocation2 + $0x60] sm:$0xff]  ;;  %v51_v6 = vld [vmem:[#allocation2 + $0x58] sm:$0xff]  ;;  %vm56_vm0 = vcmask 523264   ;;  %vm261_vm1 = vcmask 130048   ;;  %vm321_vm2 = vcmask 261120  }
  0x10   :  { %85 = vmatprep.subr.mxu0 %v55_v2  ;;  %v50_v7 = vld [vmem:[#allocation2 + $0x50] sm:$0xff]  ;;  %v49_v8 = vld [vmem:[#allocation2 + $0x48] sm:$0xff]  ;;  %v48_v9 = vld [vmem:[#allocation2 + $0x40] sm:$0xff]  ;;  %vm344_vm3 = vcmask 1041409   ;;  %vm347_vm4 = vcmask 254976  }
  0x11   :  { %86 = vmatpush1.msra.mxu0 %v54_v3  ;;  %v47_v10 = vld [vmem:[#allocation2 + $0x38] sm:$0xff]  ;;  %v46_v11 = vld [vmem:[#allocation2 + $0x30] sm:$0xff]  ;;  %v45_v12 = vld [vmem:[#allocation2 + $0x28] sm:$0xff] }
  0x12   :  { %87 = vmatprep.subr.mxu0 %v53_v4  ;;  %v44_v13 = vld [vmem:[#allocation2 + $0x20] sm:$0xff]  ;;  %v386_v14 = vld [vmem:[%s557_s3 + $0x38] sm:$0xff]   ;;  %v42_v16 = vld [vmem:[#allocation2 + $0x10] sm:$0xff] }
  0x13   :  { %88 = vmatpush1.msra.mxu0 %v52_v5  ;;  %v43_v15 = vld [vmem:[#allocation2 + $0x18] sm:$0xff]  ;;  %269 = vmatpush1.bf16.msra.mxu1 %v386_v14  ;;  %v387_v17 = vld [vmem:[%s557_s3 + $0x30] sm:$0xff]   ;;  %v41_v18 = vld [vmem:[#allocation2 + $0x8] sm:$0xff] }
  0x14   :  { %89 = vmatprep.subr.mxu0 %v51_v6  ;;  %270 = vmatprep.subr.bf16.mxu1 %v443_v1  ;;  %v40_v19 = vld [vmem:[#allocation2] sm:$0xff]  ;;  %v388_v20 = vld [vmem:[%s557_s3 + $0x28] sm:$0xff]   ;;  %v390_v24 = vld [vmem:[%s557_s3 + $0x18] sm:$0xff]  }
  0x15   :  { %90 = vmatpush1.msra.mxu0 %v50_v7  ;;  %v36_v21 = vld [vmem:[%s554_s0] sm:$0xff]  ;;  %v37_v23 = vld [vmem:[%s554_s0 + $0x8] sm:$0xff]  ;;  %v38_v25 = vld [vmem:[%s554_s0 + $0x10] sm:$0xff] }
  0x16   :  { %91 = vmatprep.subr.mxu0 %v49_v8  ;;  %v389_v22 = vld [vmem:[%s557_s3 + $0x20] sm:$0xff]   ;;  %v391_v26 = vld [vmem:[%s557_s3 + $0x10] sm:$0xff]   ;;  %v39_v27 = vld [vmem:[%s554_s0 + $0x18] sm:$0xff] }
  0x17   :  { %92 = vmatpush1.msra.mxu0 %v48_v9  ;;  %271 = vmatpush1.bf16.msra.mxu1 %v387_v17  ;;  %v392_v28 = vld [vmem:[%s557_s3 + $0x8] sm:$0xff]   ;;  %v393_v29 = vld [vmem:[%s557_s3] sm:$0xff]   ;;  %v160_v34 = vld [vmem:[%s556_s2 + $0x10] sm:$0xff] }
  0x18   :  { %93 = vmatprep.subr.mxu0 %v47_v10  ;;  %272 = vmatprep.subr.bf16.mxu1 %v443_v1  ;;  %v394_v30 = vld [vmem:[%s557_s3 + $0x40] sm:$0xff]   ;;  %v159_v33 = vld [vmem:[%s556_s2 + $0x8] sm:$0xff]  ;;  %v161_v37 = vld [vmem:[%s556_s2 + $0x18] sm:$0xff] }
  0x19   :  { %94 = vmatpush1.msra.mxu0 %v46_v11  ;;  %v158_v35 = vld [vmem:[%s556_s2] sm:$0xff] }
  0x1a   :  { %95 = vmatprep.subr.mxu0 %v45_v12  ;;  %v368_v63 = vld [vmem:[%s558_s4] ss:$0 sm:$0xff]  ;;  %s444_s4 = smov [#allocation5]  }
  0x1b   :  { %96 = vmatpush1.msra.mxu0 %v44_v13  ;;  %273 = vmatpush1.bf16.msra.mxu1 %v388_v20  ;;  %s355_s6 = sshll.u32 %s444_s4, 4  ;;  %s356_s6 = int_to_ptr.vmem [resolvable:$true] %s355_s6 }
  0x1c   :  { %97 = vmatprep.subr.mxu0 %v43_v15  ;;  %274 = vmatprep.subr.bf16.mxu1 %v443_v1  ;;  %s415_s7 = scalar_lea.vmem %s356_s6, 32  ;;  %p420_p6 = scmp.lt.s32.totalorder %s356_s6, %s356_s6 }
  0x1d   :  { %98 = vmatpush1.msra.mxu0 %v42_v16  ;;  %p416_p5 = scmp.ne.s32.totalorder %s356_s6, %s415_s7  ;;  %p421_p7 = scmp.lt.s32.totalorder %s415_s7, %s415_s7 }
  0x1e   :  { %99 = vmatprep.subr.mxu0 %v41_v18 }
  0x1f   :  { %100 = vmatpush1.msra.mxu0 %v40_v19  ;;  %275 = vmatpush1.bf16.msra.mxu1 %v389_v22  ;;  %p422_p8 = por %p421_p7, %p420_p6 }
  0x20   :  { %364 = vmatmul.mubr.msk.f32.vlgmr.msra.gmra.mxu0 %vm56_vm0, %v36_v21  ;;  %276 = vmatprep.subr.bf16.mxu1 %v443_v1 }
  0x21   :  { %139 = vmatprep.mubr.f32.mxu0 %v442_v0  ;;  %p423_p9 = pnand %p422_p8, %p416_p5 }
  0x23   :  { %277 = vmatpush1.bf16.msra.mxu1 %v390_v24 }
  0x24   :  { %365 = vmatmul.mubr.msk.f32.gmra.mxu0 %vm56_vm0, %v37_v23  ;;  %278 = vmatprep.subr.bf16.mxu1 %v443_v1 }
  0x25   :  { %145 = vmatprep.mubr.f32.mxu0 %v442_v0 }
  0x27   :  { %279 = vmatpush1.bf16.msra.mxu1 %v391_v26 }
  0x28   :  { %366 = vmatmul.mubr.msk.f32.gmra.mxu0 %vm56_vm0, %v38_v25  ;;  %280 = vmatprep.subr.bf16.mxu1 %v443_v1 }
  0x29   :  { %151 = vmatprep.mubr.f32.mxu0 %v442_v0 }
  0x2b   :  { %281 = vmatpush1.bf16.msra.mxu1 %v392_v28 }
  0x2c   :  { %367 = vmatmul.mubr.msk.f32.gmra.mxu0 %vm56_vm0, %v39_v27  ;;  %282 = vmatprep.subr.bf16.mxu1 %v443_v1 }
  0x2f   :  { %283 = vmatpush1.bf16.msra.mxu1 %v393_v29 }
  0x30   :  { %298 = vmatprep.subr.bf16.mxu1 %v443_v1 }
  0x33   :  { %299 = vmatpush2.bf16.msra.mxu1 %v394_v30 }
  0xe0   :  { %v135_v31 = vpop.f32.mrf.mxu0 }
  0xe1   :  { %v162_v40 = vadd.f32 %v158_v35, %v135_v31 }
  0xe2   :  { %v137_v32 = vpop.f32.mrf.mxu0 }
  0xe3   :  { %v163_v38 = vadd.f32 %v159_v33, %v137_v32  ;;  %v170_v47 = vmax.f32 %v162_v40, 0.0 }
  0xe4   :  { %v141_v36 = vpop.f32.mrf.mxu0 }
  0xe5   :  { %v164_v39 = vadd.f32 %v160_v34, %v141_v36  ;;  %v171_v45 = vmax.f32 %v163_v38, 0.0 }
  0xe6   :  { %v143_v41 = vpop.f32.mrf.mxu0 }
  0xe7   :  { %v165_v42 = vadd.f32 %v161_v37, %v143_v41  ;;  %v172_v43 = vmax.f32 %v164_v39, 0.0 }
  0xe8   :  { %v147_v44 = vpop.f32.mrf.mxu0 }
  0xe9   :  { %v173_v46 = vmax.f32 %v165_v42, 0.0  ;;  %v178_v50 = vpack.c.bf16 %v172_v43, %v170_v47  ;;  %v166_v54 = vadd.f32 %v158_v35, %v147_v44 }
  0xea   :  { %v149_v48 = vpop.f32.mrf.mxu0 }
  0xeb   :  { %v179_v49 = vpack.c.bf16 %v173_v46, %v171_v45  ;;  %v167_v52 = vadd.f32 %v159_v33, %v149_v48  ;;  %v174_v60 = vmax.f32 %v166_v54, 0.0 }
  0xec   :  { %v153_v51 = vpop.f32.mrf.mxu0 }
  0xed   :  { %v168_v53 = vadd.f32 %v160_v34, %v153_v51  ;;  %378 = vmatprep.mubr.msk.bf16.mxu1 %vm261_vm1, %v179_v49  ;;  %v175_v58 = vmax.f32 %v167_v52, 0.0 }
  0xee   :  { %v155_v55 = vpop.f32.mrf.mxu0  ;;  %301 = vmatmul.mubr.bf16.vlgmr.msra.gmra.mxu1 %v178_v50 }
  0xef   :  { %v169_v56 = vadd.f32 %v161_v37, %v155_v55  ;;  %v176_v57 = vmax.f32 %v168_v53, 0.0 }
  0xf1   :  { %v177_v59 = vmax.f32 %v169_v56, 0.0  ;;  %v180_v62 = vpack.c.bf16 %v176_v57, %v174_v60 }
  0xf3   :  { %v181_v61 = vpack.c.bf16 %v177_v59, %v175_v58 }
  0xf5   :  { %379 = vmatprep.mubr.msk.bf16.mxu1 %vm261_vm1, %v181_v61 }
  0xf6   :  { %309 = vmatmul.mubr.bf16.gmra.mxu1 %v180_v62 }
 0x1ae   :  { %v302_v0 = vpop.f32.mrf.mxu1 }
 0x1af   :  { %v303_v1 = vadd.f32 %v368_v63, %v302_v0 }
 0x1b0   :  { %v304_v2 = vpop.f32.mrf.mxu1 }
 0x1b1   :  { %v317_v4 = vmax.f32 %v303_v1, 0.0 }
 0x1b2   :  { %v305_v3 = vpop.f32.mrf.mxu1 }
 0x1b3   :  { %v306_v5 = vadd.f32 %v368_v63, %v305_v3  ;;  %v322_v9 = vsel %vm321_vm2, %v317_v4, 0.0 }
 0x1b4   :  { %v307_v6 = vpop.f32.mrf.mxu1 }
 0x1b5   :  { %v318_v7 = vmax.f32 %v306_v5, 0.0 }
 0x1b6   :  { %v310_v8 = vpop.f32.mrf.mxu1 }
 0x1b7   :  { %v323_v10 = vsel %vm321_vm2, %v318_v7, 0.0  ;;  %v311_v11 = vadd.f32 %v368_v63, %v310_v8 }
 0x1b8   :  { %v324_v12 = vadd.f32 %v323_v10, %v322_v9  ;;  %v312_v13 = vpop.f32.mrf.mxu1 }
 0x1b9   :  { %v319_v16 = vmax.f32 %v311_v11, 0.0 }
 0x1ba   :  { %v325_v14 = vrot.slane %v324_v12, 4  ;;  %v313_v15 = vpop.f32.mrf.mxu1 }
 0x1bb   :  { %v314_v17 = vadd.f32 %v368_v63, %v313_v15  ;;  %v331_v22 = vsel %vm321_vm2, %v319_v16, 0.0 }
 0x1bc   :  { %v326_v18 = vadd.f32 %v325_v14, %v324_v12  ;;  %v315_v19 = vpop.f32.mrf.mxu1 }
 0x1bd   :  { %v320_v20 = vmax.f32 %v314_v17, 0.0 }
 0x1be   :  { %v327_v21 = vrot.slane %v326_v18, 2 }
 0x1bf   :  { %v332_v23 = vsel %vm321_vm2, %v320_v20, 0.0 }
 0x1c0   :  { %v333_v24 = vadd.f32 %v332_v23, %v331_v22  ;;  %v328_v25 = vadd.f32 %v327_v21, %v326_v18 }
 0x1c2   :  { %v334_v26 = vrot.slane %v333_v24, 4  ;;  %v329_v28 = vrot.slane %v328_v25, 1 }
 0x1c4   :  { %v335_v27 = vadd.f32 %v334_v26, %v333_v24  ;;  %v330_v32 = vadd.f32 %v329_v28, %v328_v25 }
 0x1c6   :  { %v336_v29 = vrot.slane %v335_v27, 2  ;;  %v340_v34 = vmul.f32 0.0625, %v330_v32 }
 0x1c8   :  { %v337_v30 = vadd.f32 %v336_v29, %v335_v27 }
 0x1ca   :  { %v338_v31 = vrot.slane %v337_v30, 1 }
 0x1cc   :  { %v339_v33 = vadd.f32 %v338_v31, %v337_v30 }
 0x1ce   :  { %v341_v35 = vmul.f32 0.0625, %v339_v33 }
 0x1d0   :  { %v345_v36 = vsel %vm344_vm3, %v341_v35, %v340_v34 }
 0x1d1   :  { %348 = vst.msk [vmem:[#allocation5] sm:$0x3] %vm347_vm4, %v345_v36 }
 0x1d2   :  { %426 = shalt.err (!%p423_p9)
}
 0x1d3   :  { %358 = dma.vmem_to_hbm [thread:$0]  %s356_s6, 32, %s559_s5, [#allocation4]  }
 0x1d4   :  { %437 = dma.done.wait [#allocation4], 32  }
 0x1d5   :  { %438 = vsyncadd [#allocation4], 4294967264 }
 0x1d6   :  { %362 = vsyncpa [#allocation3], 1 }
 0x1d7   :  { %363 = vsyncpa [#allocation4], 1 }

</bundles_post_ra>
